<compile_context>
chip_gen: v5e
topology: v5e:2x2
jax: 0.10.0
libtpu: 0.0.40
codegen_flags: <defaults>
</compile_context>

<pallas_src>
import jax
import jax.numpy as jnp
from jax.experimental import pallas as pl
from jax.experimental.pallas import tpu as pltpu

ALPHA = 0.995
EPS = 1e-12          # only used by the pure-JAX reference (matches the PyTorch spec)
_PAD_LOGIT = -1e4    # softplus(-1e4) == 0 exactly in f32 -> padded rows contribute 0


def _criterion_kernel(pred_ref, mask_ref, bbox_ref, part_ref):
    # pred_ref : (1, C,   T, 128)   native dtype
    # mask_ref : (1,      T, 128)
    # bbox_ref : (1, C-1, T, 128)
    # part_ref : (1, 1, 3, 128)     f32 partials
    # Upcast right after load (inputs may be bf16/fp16); all math stays in f32.
    logit = pred_ref[0, 0].astype(jnp.float32)      # (T, 128) mask-logit channel
    m = mask_ref[0].astype(jnp.float32)             # (T, 128)
    pb = pred_ref[0, 1:].astype(jnp.float32)        # (C-1, T, 128) bbox predictions
    bb = bbox_ref[0].astype(jnp.float32)            # (C-1, T, 128)

    # Weighted BCE in logit space:
    #   alpha*m*log(sigmoid(x)) + (1-alpha)*(1-m)*log(1-sigmoid(x))
    # = alpha*m*x - w*softplus(x),  w = (1-alpha) + (2*alpha-1)*m
    w = (1.0 - ALPHA) + (2.0 * ALPHA - 1.0) * m
    sp = jax.nn.softplus(logit)                     # 1 exp + 1 log per element (EUP)
    ml = ALPHA * m * logit - w * sp

    # Masked L1 for the bbox channels.
    diff = jnp.sum(jnp.abs(pb - bb), axis=0)        # (T, 128)

    # Lane-dense per-tile partials: reduce only over the sublane (row) axis;
    # cross-lane / cross-tile sums happen once in the wrapper.
    # Direct row stores (no concatenate/reshape relayout).
    part_ref[0, 0, 0:1, :] = jnp.sum(ml, axis=0, keepdims=True)        # BCE sum
    part_ref[0, 0, 1:2, :] = jnp.sum(diff * m, axis=0, keepdims=True)  # L1 numerator
    part_ref[0, 0, 2:3, :] = jnp.sum(m, axis=0, keepdims=True)         # mask denominator


def _choose_tile(hw, C, B, itemsize, vmem_budget_bytes=12 * 1024 * 1024):
    """Pick the spatial tile size T (rows of 128 lanes) and tile count.

    T is chosen for throughput (target 512 rows, past the HBM-roofline
    plateau), capped so double-buffered input blocks stay within the VMEM
    budget (important on v7x's 64 MiB/TC), rounded to the (8,128) tiling
    grain, and shrunk if needed so both v7x TensorCores get grid work.
    """
    s_rows = -(-hw // 128)                       # rows of 128 lanes covering H*W
    s_rows8 = max(8, -(-s_rows // 8) * 8)        # round up to sublane multiple
    per_row = 2 * C * 128 * itemsize             # pred(C) + bbox(C-1) + mask(1) channels
    max_rows = max(8, (vmem_budget_bytes // (2 * per_row)) // 8 * 8)  # 2x double-buffer
    t = min(512, max_rows, s_rows8)
    t = max(8, (t // 8) * 8)
    # v7x megacore: guarantee >= 2 grid steps so neither TensorCore idles.
    while B * (-(-s_rows8 // t)) < 2 and t > 8:
        t = max(8, ((t // 2) // 8) * 8)
    n_tiles = -(-s_rows8 // t)
    return t, n_tiles


def criterion(prediction, mask, bbox, *, vmem_budget_bytes=12 * 1024 * 1024):
    B, C, H, W = prediction.shape
    assert mask.shape == (B, H, W)
    assert bbox.shape == (B, C - 1, H, W)
    hw = H * W

    T, n_tiles = _choose_tile(hw, C, B,
                              jnp.dtype(prediction.dtype).itemsize,
                              vmem_budget_bytes)
    padded = n_tiles * T * 128
    pad = padded - hw

    # Keep native dtype (bf16 halves HBM traffic); kernel upcasts after load.
    pred_f = prediction.reshape(B, C, hw)
    mask_f = mask.reshape(B, hw)
    bbox_f = bbox.reshape(B, C - 1, hw)
    if pad:
        # Pad logits with a huge negative (softplus == 0) and mask with 0 so
        # padded elements contribute exactly 0 to every partial sum; bbox pad
        # values are irrelevant (always multiplied by mask == 0).
        pred_f = jnp.pad(pred_f, ((0, 0), (0, 0), (0, pad)),
                         constant_values=_PAD_LOGIT)
        mask_f = jnp.pad(mask_f, ((0, 0), (0, pad)))
        bbox_f = jnp.pad(bbox_f, ((0, 0), (0, 0), (0, pad)))

    pred_r = pred_f.reshape(B, C, n_tiles * T, 128)
    mask_r = mask_f.reshape(B, n_tiles * T, 128)
    bbox_r = bbox_f.reshape(B, C - 1, n_tiles * T, 128)

    partials = pl.pallas_call(
        _criterion_kernel,
        out_shape=jax.ShapeDtypeStruct((B, n_tiles, 3, 128), jnp.float32),
        grid_spec=pltpu.PrefetchScalarGridSpec(
            num_scalar_prefetch=0,
            grid=(B, n_tiles),
            in_specs=[
                pl.BlockSpec((1, C, T, 128), lambda b, s: (b, 0, s, 0)),
                pl.BlockSpec((1, T, 128), lambda b, s: (b, s, 0)),
                pl.BlockSpec((1, C - 1, T, 128), lambda b, s: (b, 0, s, 0)),
            ],
            out_specs=pl.BlockSpec((1, 1, 3, 128), lambda b, s: (b, s, 0, 0)),
        ),
        compiler_params=pltpu.CompilerParams(
            dimension_semantics=("parallel", "parallel"),
            vmem_limit_bytes=32 * 1024 * 1024),
    )(pred_r, mask_r, bbox_r)

    # Final (tiny) reductions in the wrapper: sum tile/lane partials per image.
    mask_sum = jnp.sum(partials[:, :, 0, :], axis=(1, 2))   # (B,)
    num = jnp.sum(partials[:, :, 1, :], axis=(1, 2))        # (B,)
    den = jnp.sum(partials[:, :, 2, :], axis=(1, 2))        # (B,)

    mask_loss = -jnp.mean(mask_sum)        # -mean over batch of sum over H,W
    # TODO(synk): an all-zero mask image yields NaN here, matching the PyTorch
    # reference; guard with jnp.where(den > 0, num / den, 0) if that can occur.
    box_loss = jnp.mean(num / den)         # mean over batch of per-image ratio
    loss = mask_loss + box_loss
    return dict(loss=loss, mask_loss=mask_loss, box_loss=box_loss)


def criterion_ref(prediction, mask, bbox):
    """Pure-JAX reference matching the PyTorch module exactly."""
    prediction = prediction.astype(jnp.float32)
    mask = mask.astype(jnp.float32)
    bbox = bbox.astype(jnp.float32)
    pred_mask = jax.nn.sigmoid(prediction[:, 0])
    ml = (ALPHA * mask * jnp.log(pred_mask + EPS)
          + (1.0 - ALPHA) * (1.0 - mask) * jnp.log(1.0 - pred_mask + EPS))
    mask_loss = -jnp.sum(jnp.mean(ml, axis=0))
    pred_bbox = prediction[:, 1:]
    box_loss = (jnp.sum(jnp.abs(pred_bbox - bbox), axis=1) * mask)
    box_loss = jnp.sum(box_loss, axis=(1, 2)) / jnp.sum(mask, axis=(1, 2))
    box_loss = jnp.mean(box_loss)
    return dict(loss=mask_loss + box_loss,
                mask_loss=mask_loss, box_loss=box_loss)


if __name__ == "__main__":
    key = jax.random.PRNGKey(0)
    k1, k2, k3 = jax.random.split(key, 3)
    B, C, H, W = 2, 5, 16, 16   # channel 0 = mask logit, 1..4 = bbox preds

    # --- f32 path, spatial multiple of 128 ---------------------------------
    prediction = jax.random.normal(k1, (B, C, H, W), dtype=jnp.float32)
    mask = (jax.random.uniform(k2, (B, H, W)) > 0.3).astype(jnp.float32)
    bbox = jax.random.uniform(k3, (B, C - 1, H, W), dtype=jnp.float32)

    out = criterion(prediction, mask, bbox)
    out = jax.tree_util.tree_map(jax.block_until_ready, out)
    ref = criterion_ref(prediction, mask, bbox)
    for k in ("loss", "mask_loss", "box_loss"):
        assert jnp.allclose(out[k], ref[k], rtol=1e-4, atol=1e-4), (
            k, out[k], ref[k])

    # --- bf16 path, ragged spatial size (exercises padding + native dtype) --
    H2, W2 = 10, 13            # H*W = 130, not a multiple of 128
    p2 = jax.random.normal(k1, (B, C, H2, W2), dtype=jnp.float32).astype(jnp.bfloat16)
    m2 = (jax.random.uniform(k2, (B, H2, W2)) > 0.3).astype(jnp.bfloat16)
    b2 = jax.random.uniform(k3, (B, C - 1, H2, W2),
                            dtype=jnp.float32).astype(jnp.bfloat16)
    out2 = criterion(p2, m2, b2)
    out2 = jax.tree_util.tree_map(jax.block_until_ready, out2)
    ref2 = criterion_ref(p2, m2, b2)
    for k in ("loss", "mask_loss", "box_loss"):
        assert jnp.allclose(out2[k], ref2[k], rtol=2e-2, atol=2e-2), (
            k, out2[k], ref2[k])

    print("KERNEL_OK")
</pallas_src>

<mosaic_0001>
module attributes {stable_mosaic.version = 11 : i64} {
  func.func @_criterion_kernel(%arg0: i32, %arg1: i32, %arg2: memref<1x5x8x128xf32, #tpu.memory_space<vmem>>, %arg3: memref<1x8x128xf32, #tpu.memory_space<vmem>>, %arg4: memref<1x4x8x128xf32, #tpu.memory_space<vmem>>, %arg5: memref<1x1x3x128xf32, #tpu.memory_space<vmem>>) attributes {dimension_semantics = [#tpu.dimension_semantics<parallel>, #tpu.dimension_semantics<parallel>], iteration_bounds = array<i64: 2, 1>, scalar_prefetch = 0 : i64, scratch_operands = 0 : i64, tpu.core_type = #tpu.core_type<tc>, window_params = [{transform_indices = @transform_0, window_bounds = array<i64: 1, 5, 8, 128>}, {transform_indices = @transform_1, window_bounds = array<i64: 1, 8, 128>}, {transform_indices = @transform_2, window_bounds = array<i64: 1, 4, 8, 128>}, {transform_indices = @transform_3, window_bounds = array<i64: 1, 1, 3, 128>}]} {
    %c0 = arith.constant 0 : index
    %c0_0 = arith.constant 0 : index
    %c0_1 = arith.constant 0 : index
    %c0_2 = arith.constant 0 : index
    %0 = vector.load %arg2[%c0, %c0_0, %c0_1, %c0_2] : memref<1x5x8x128xf32, #tpu.memory_space<vmem>>, vector<1x1x8x128xf32>
    %1 = vector.shape_cast %0 : vector<1x1x8x128xf32> to vector<8x128xf32>
    %c0_3 = arith.constant 0 : index
    %c0_4 = arith.constant 0 : index
    %c0_5 = arith.constant 0 : index
    %2 = vector.load %arg3[%c0_3, %c0_4, %c0_5] : memref<1x8x128xf32, #tpu.memory_space<vmem>>, vector<1x8x128xf32>
    %3 = vector.shape_cast %2 : vector<1x8x128xf32> to vector<8x128xf32>
    %c0_6 = arith.constant 0 : index
    %c1 = arith.constant 1 : index
    %c0_7 = arith.constant 0 : index
    %c0_8 = arith.constant 0 : index
    %4 = vector.load %arg2[%c0_6, %c1, %c0_7, %c0_8] : memref<1x5x8x128xf32, #tpu.memory_space<vmem>>, vector<1x4x8x128xf32>
    %5 = vector.shape_cast %4 : vector<1x4x8x128xf32> to vector<4x8x128xf32>
    %c0_9 = arith.constant 0 : index
    %c0_10 = arith.constant 0 : index
    %c0_11 = arith.constant 0 : index
    %c0_12 = arith.constant 0 : index
    %6 = vector.load %arg4[%c0_9, %c0_10, %c0_11, %c0_12] : memref<1x4x8x128xf32, #tpu.memory_space<vmem>>, vector<1x4x8x128xf32>
    %7 = vector.shape_cast %6 : vector<1x4x8x128xf32> to vector<4x8x128xf32>
    %cst = arith.constant 9.900000e-01 : f32
    %8 = vector.broadcast %cst : f32 to vector<8x128xf32>
    %9 = arith.mulf %8, %3 : vector<8x128xf32>
    %cst_13 = arith.constant 5.000000e-03 : f32
    %10 = vector.broadcast %cst_13 : f32 to vector<8x128xf32>
    %11 = arith.addf %10, %9 : vector<8x128xf32>
    %cst_14 = arith.constant 0.000000e+00 : f32
    %12 = vector.broadcast %cst_14 : f32 to vector<8x128xf32>
    %13 = arith.maximumf %1, %12 : vector<8x128xf32>
    %14 = vector.broadcast %cst_14 : f32 to vector<8x128xf32>
    %15 = arith.subf %1, %14 : vector<8x128xf32>
    %16 = arith.cmpf one, %15, %15 : vector<8x128xf32>
    %17 = vector.broadcast %cst_14 : f32 to vector<8x128xf32>
    %18 = arith.addf %1, %17 : vector<8x128xf32>
    %19 = math.absf %15 : vector<8x128xf32>
    %cst_15 = arith.constant 0.000000e+00 : f32
    %20 = vector.broadcast %cst_15 : f32 to vector<8x128xf32>
    %21 = arith.subf %20, %19 : vector<8x128xf32>
    %22 = math.exp %21 : vector<8x128xf32>
    %23 = math.log1p %22 : vector<8x128xf32>
    %24 = arith.addf %13, %23 : vector<8x128xf32>
    %25 = arith.select %16, %18, %24 : vector<8x128xi1>, vector<8x128xf32>
    %cst_16 = arith.constant 9.950000e-01 : f32
    %26 = vector.broadcast %cst_16 : f32 to vector<8x128xf32>
    %27 = arith.mulf %26, %3 : vector<8x128xf32>
    %28 = arith.mulf %27, %1 : vector<8x128xf32>
    %29 = arith.mulf %11, %25 : vector<8x128xf32>
    %30 = arith.subf %28, %29 : vector<8x128xf32>
    %31 = arith.subf %5, %7 : vector<4x8x128xf32>
    %32 = math.absf %31 : vector<4x8x128xf32>
    %cst_17 = arith.constant dense<0.000000e+00> : vector<8x128xf32>
    %33 = vector.multi_reduction <add>, %32, %cst_17 [0] : vector<4x8x128xf32> to vector<8x128xf32>
    %cst_18 = arith.constant dense<0.000000e+00> : vector<128xf32>
    %34 = vector.multi_reduction <add>, %30, %cst_18 [0] : vector<8x128xf32> to vector<128xf32>
    %35 = vector.shape_cast %34 : vector<128xf32> to vector<1x128xf32>
    %c0_19 = arith.constant 0 : index
    %c0_20 = arith.constant 0 : index
    %c0_21 = arith.constant 0 : index
    %c0_22 = arith.constant 0 : index
    %36 = vector.load %arg5[%c0_19, %c0_20, %c0_21, %c0_22] : memref<1x1x3x128xf32, #tpu.memory_space<vmem>>, vector<1x1x1x128xf32>
    %37 = vector.shape_cast %36 : vector<1x1x1x128xf32> to vector<1x128xf32>
    %38 = vector.shape_cast %35 : vector<1x128xf32> to vector<1x1x1x128xf32>
    tpu.vector_store %arg5[%c0_19, %c0_20, %c0_21, %c0_22], %38 {strides = array<i32>} : memref<1x1x3x128xf32, #tpu.memory_space<vmem>>, vector<1x1x1x128xf32>,
    %39 = arith.mulf %33, %3 : vector<8x128xf32>
    %cst_23 = arith.constant dense<0.000000e+00> : vector<128xf32>
    %40 = vector.multi_reduction <add>, %39, %cst_23 [0] : vector<8x128xf32> to vector<128xf32>
    %41 = vector.shape_cast %40 : vector<128xf32> to vector<1x128xf32>
    %c0_24 = arith.constant 0 : index
    %c0_25 = arith.constant 0 : index
    %c1_26 = arith.constant 1 : index
    %c0_27 = arith.constant 0 : index
    %42 = vector.load %arg5[%c0_24, %c0_25, %c1_26, %c0_27] : memref<1x1x3x128xf32, #tpu.memory_space<vmem>>, vector<1x1x1x128xf32>
    %43 = vector.shape_cast %42 : vector<1x1x1x128xf32> to vector<1x128xf32>
    %44 = vector.shape_cast %41 : vector<1x128xf32> to vector<1x1x1x128xf32>
    tpu.vector_store %arg5[%c0_24, %c0_25, %c1_26, %c0_27], %44 {strides = array<i32>} : memref<1x1x3x128xf32, #tpu.memory_space<vmem>>, vector<1x1x1x128xf32>,
    %cst_28 = arith.constant dense<0.000000e+00> : vector<128xf32>
    %45 = vector.multi_reduction <add>, %3, %cst_28 [0] : vector<8x128xf32> to vector<128xf32>
    %46 = vector.shape_cast %45 : vector<128xf32> to vector<1x128xf32>
    %c0_29 = arith.constant 0 : index
    %c0_30 = arith.constant 0 : index
    %c2 = arith.constant 2 : index
    %c0_31 = arith.constant 0 : index
    %47 = vector.load %arg5[%c0_29, %c0_30, %c2, %c0_31] : memref<1x1x3x128xf32, #tpu.memory_space<vmem>>, vector<1x1x1x128xf32>
    %48 = vector.shape_cast %47 : vector<1x1x1x128xf32> to vector<1x128xf32>
    %49 = vector.shape_cast %46 : vector<1x128xf32> to vector<1x1x1x128xf32>
    tpu.vector_store %arg5[%c0_29, %c0_30, %c2, %c0_31], %49 {strides = array<i32>} : memref<1x1x3x128xf32, #tpu.memory_space<vmem>>, vector<1x1x1x128xf32>,
    return
  }
  func.func @transform_0(%arg0: i32, %arg1: i32) -> (i32, i32, i32, i32) {
    %c0_i32 = arith.constant 0 : i32
    %c0_i32_0 = arith.constant 0 : i32
    %c0_i32_1 = arith.constant 0 : i32
    return %arg0, %c0_i32, %arg1, %c0_i32_0 : i32, i32, i32, i32
  }
  func.func @transform_1(%arg0: i32, %arg1: i32) -> (i32, i32, i32) {
    %c0_i32 = arith.constant 0 : i32
    %c0_i32_0 = arith.constant 0 : i32
    return %arg0, %arg1, %c0_i32 : i32, i32, i32
  }
  func.func @transform_2(%arg0: i32, %arg1: i32) -> (i32, i32, i32, i32) {
    %c0_i32 = arith.constant 0 : i32
    %c0_i32_0 = arith.constant 0 : i32
    %c0_i32_1 = arith.constant 0 : i32
    return %arg0, %c0_i32, %arg1, %c0_i32_0 : i32, i32, i32, i32
  }
  func.func @transform_3(%arg0: i32, %arg1: i32) -> (i32, i32, i32, i32) {
    %c0_i32 = arith.constant 0 : i32
    %c0_i32_0 = arith.constant 0 : i32
    %c0_i32_1 = arith.constant 0 : i32
    return %arg0, %arg1, %c0_i32, %c0_i32_0 : i32, i32, i32, i32
  }
}

</mosaic_0001>

<bundles_post_ra>
// kernel: tpu_custom_call.1
= control target key start
LH: loop header
LB: loop body
LE: loop exit
PB: predicated region body
PF: predicated region fallthrough
CT: control target
= control target key end

     0   :  { %s896_s0 = inlined_call_operand.hbm [shape: f32[2,5,8,128], index: 0, kind: input, shape index: {}]   ;;  %s897_s1 = inlined_call_operand.hbm [shape: f32[2,8,128], index: 1, kind: input, shape index: {}]   ;;  %s898_s2 = inlined_call_operand.hbm [shape: f32[2,4,8,128], index: 2, kind: input, shape index: {}]   ;;  %s899_s3 = inlined_call_operand.vmem [shape: f32[2,1,3,128], index: 3, kind: output, shape index: {}]  }
   0x1   :  { %902 = sst [smem:[#allocation11_spill]] %s897_s1 }
   0x2   :  { %8 = vsyncpa [#allocation3], 0 }
   0x3   :  { %10 = vsyncpa [#allocation3 + $0x1], 0 }
   0x4   :  { %11 = vsyncpa [#allocation5], 0 }
   0x5   :  { %13 = vsyncpa [#allocation5 + $0x1], 0  ;;  %s760_s12 = smov 0   ;;  %s762_s13 = smov 0  }
   0x6   :  { %s764_s14 = smov 0   ;;  %s766_s15 = smov 0  }
   0x7   :  { %s768_s16 = smov 0   ;;  %s770_s17 = smov 0  }
   0x8 LB: > { %s900_s18 = sadd.s32 4294967295, %s736_s17   ;;  %s31_s19 = sadd.s32 1, %s732_s16  ;;  %s736_s17 = sphi %s770_s17, %s19_s17   ;;  %s732_s16 = sphi %s768_s16, %s916_s16   ;;  %s728_s15 = sphi %s766_s15, %s915_s15   ;;  %s724_s14 = sphi %s764_s14, %s914_s14   ;;  %s720_s13 = sphi %s762_s13, %s913_s13   ;;  %s716_s12 = sphi %s760_s12, %s912_s12  }
   0x9   : > { %p33_p0 = scmp.ge.s32.totalorder %s31_s19, 2  ;;  %s40_s20 = sadd.s32 1, %s724_s14 }
   0xa   : > { %p47_p1 = scmp.ne.s32.totalorder %s724_s14, %s720_s13  ;;  %p48_p2 = scmp.eq.s32.totalorder %s736_s17, 0 }
   0xb   : > { %s918_s19 = smov (%p33_p0, %s31_s19), 0  ;;  %p53_p4 = scmp.ne.s32.totalorder %s720_s13, %s716_s12 }
   0xc   : > { %903 = sst [smem:[#allocation9_spill]] %s918_s19  ;;  %p49_p3 = por %p48_p2, %p47_p1 }
   0xd   : > { %s35_s21 = ssub.s32 %s732_s16, %s918_s19  ;;  %p54_p5 = scmp.eq.s32.totalorder %s900_s18, 0 }
   0xe   : > { %p38_p6 = scmp.eq.s32.totalorder %s35_s21, 0  ;;  %p537_p8 = scmp.lt.s32.totalorder %s736_s17, 2 }
   0xf   : > { %p801_p7 = por %p54_p5, %p53_p4  ;;  %s810_s24 = sand.u32 1, %s724_s14  }
  0x10   : > { %s807_s23 = scalar_select %p38_p6, %s724_s14, %s40_s20  }
  0x11   : > { %p812_p9 = pnand %p537_p8, %p49_p3  ;;  %s184_s26 = sand.u32 1, %s736_s17  }
  0x12   : > { %905 = sst [smem:[#allocation10_spill]] %s807_s23  ;;  %s502_s27 = sshll.u32 %s810_s24, 3 }
  0x13   : > { %s503_s28 = sshll.u32 %s732_s16, 3  ;;  %s907_s1 = sld [smem:[#allocation11_spill]] }
  0x14   : > { %s188_s5 = scalar_lea.vmem [#allocation4], %s502_s27  ;;  %s504_s8 = sshll.u32 %s810_s24, 5 }
  0x15   : > { %s197_s6 = sshll.u32 %s188_s5, 4  ;;  %s185_s9 = scalar_lea.sflag [#allocation5], %s184_s26  ;;  %s198_s6 = int_to_ptr.vmem [resolvable:$true] %s197_s6 }
  0x16   : > { %p507_p10 = scmp.ge.s32.totalorder %s736_s17, 1  ;;  %p225_p11 = scmp.lt.s32.totalorder %s736_s17, 3 }
  0x17   : > { %s518_s11 = smul.u32 40, %s810_s24  ;;  %s517_s26 = sshll.u32 %s732_s16, 5 }
  0x18   : > { %p827_p12 = pnand %p507_p10, %p225_p11  ;;  %s519_s12 = smul.u32 40, %s732_s16 }
  0x19   : > { %s193_s4 = scalar_lea.hbm %s907_s1, %s503_s28  ;;  %s165_s28 = scalar_lea.vmem [#allocation2], %s518_s11 }
  0x1a   : > { %s195_s7 = sshll.u32 %s193_s4, 4  ;;  %s171_s27 = scalar_lea.hbm %s896_s0, %s519_s12  ;;  %s196_s7 = int_to_ptr.hbm [resolvable:$true] %s195_s7 }
  0x1b   : > { %533 = dma.hbm_to_vmem [thread:$0]  (!%p812_p9), %s196_s7, 128, %s198_s6, %s185_s9  }
  0x1c   : > { %s174_s29 = sshll.u32 %s165_s28, 4  ;;  %s172_s30 = sshll.u32 %s171_s27, 4  ;;  %s175_s29 = int_to_ptr.vmem [resolvable:$true] %s174_s29  ;;  %s173_s30 = int_to_ptr.hbm [resolvable:$true] %s172_s30 }
  0x1d   : > { %s162_s4 = scalar_lea.sflag [#allocation3], %s810_s24  ;;  %s738_s5 = smov 128  }
  0x1e   : > { %s739_s6 = smov 8   ;;  %s214_s1 = scalar_lea.hbm %s898_s2, %s517_s26 }
  0x1f   : > { %530 = dma.hbm_to_vmem [thread:$0]  (!%p812_p9), %s173_s30, 640, %s175_s29, %s162_s4, %s738_s5, %s738_s5, %s739_s6  }
  0x20   : > { %s208_s19 = scalar_lea.vmem [#allocation6], %s504_s8  ;;  %s215_s20 = sshll.u32 %s214_s1, 4  ;;  %s216_s20 = int_to_ptr.hbm [resolvable:$true] %s215_s20 }
  0x21   : > { %s217_s23 = sshll.u32 %s208_s19, 4  ;;  %229 = sbr.rel (%p827_p12) target bundleno = 90 (0x5a), region = 32  ;;  %s218_s23 = int_to_ptr.vmem [resolvable:$true] %s217_s23 }
  0x22   : > { %536 = dma.hbm_to_vmem [thread:$0]  (!%p812_p9), %s216_s20, 512, %s218_s23, %s185_s9, %s738_s5, %s738_s5, %s739_s6  }
  0x23   : > { %s231_s24 = sand.u32 (!%p827_p12), 1, %s720_s13  }
  0x24   : > { %s520_s11 = smul.u32 (!%p827_p12), 40, %s231_s24  ;;  %s232_s12 = scalar_lea.sflag (!%p827_p12), [#allocation3], %s231_s24 }
  0x26   : > { %s235_s21 = scalar_lea.vmem [#allocation2], %s520_s11 }
  0x27   : > { %707 = dma.done.wait (%p801_p7), %s232_s12, 640  }
  0x28   : > { %709 = vsyncadd (%p801_p7), %s232_s12, 4294966656  ;;  %s909_s1 = sadd.s32 4294967295, %s736_s17   ;;  %s508_s19 = sshll.u32 %s231_s24, 3 }
  0x29   : > { %s241_s18 = sand.u32 1, %s909_s1   ;;  %s245_s25 = scalar_lea.vmem [#allocation4], %s508_s19 }
  0x2a   : > { %s242_s23 = scalar_lea.sflag [#allocation5], %s241_s18 }
  0x2b   : > { %711 = dma.done.wait (%p801_p7), %s242_s23, 640  }
  0x2c   : > { %713 = vsyncadd (%p801_p7), %s242_s23, 4294966656  ;;  %s509_s8 = sshll.u32 %s231_s24, 5  ;;  %v858_v0 = vld [vmem:[%s235_s21] sm:$0xff]  ;;  %v511_v1 = vld [vmem:[%s235_s21 + $0x8] sm:$0xff]  ;;  %p291_p13 = scmp.lt.s32.totalorder %s728_s15, 1 }
  0x2d   : > { %v299_v2 = vld [vmem:[%s245_s25] sm:$0xff]  ;;  %v314_v3 = vand.u32 2147483647, %v858_v0  ;;  %v513_v5 = vld [vmem:[%s235_s21 + $0x18] sm:$0xff]  ;;  %v514_v6 = vld [vmem:[%s235_s21 + $0x20] sm:$0xff]  ;;  %s255_s9 = scalar_lea.vmem [#allocation6], %s509_s8  ;;  %vm312_vm1 = vcmp.ne.f32.partialorder %v858_v0, %v858_v0 }
  0x2e   : > { %v512_v4 = vld [vmem:[%s235_s21 + $0x10] sm:$0xff]  ;;  %v305_v7 = vld [vmem:[%s255_s9] sm:$0xff]  ;;  %v359_v8 = vrot.slane %v299_v2, 4  ;;  %v306_v10 = vld [vmem:[%s255_s9 + $0x8] sm:$0xff]  ;;  %s920_s15 = smov (!%p291_p13, %s728_s15), 1  ;;  %v311_v42 = vmax.f32 %v858_v0, 0.0 }
  0x2f   : > { %v315_v9 = vsub.f32 0.0, %v314_v3  ;;  %v307_v11 = vld [vmem:[%s255_s9 + $0x10] sm:$0xff]  ;;  %v308_v12 = vld [vmem:[%s255_s9 + $0x18] sm:$0xff]  ;;  %v333_v13 = vsub.f32 %v511_v1, %v305_v7  ;;  %v334_v14 = vsub.f32 %v512_v4, %v306_v10  ;;  %s510_s22 = sshll.u32 %s920_s15, 2  ;;  %v309_v39 = vmul.f32 0.99, %v299_v2 }
  0x30   : > { %v335_v15 = vsub.f32 %v513_v5, %v307_v11  ;;  %v336_v16 = vsub.f32 %v514_v6, %v308_v12  ;;  %v360_v19 = vadd.f32 %v359_v8, %v299_v2  ;;  %s868_s28 = scalar_lea.vmem %s899_s3, %s510_s22  ;;  %v329_v45 = vmul.f32 0.995, %v299_v2 }
  0x31   : > { %v316_v17 = vmul.f32 1.442695, %v315_v9  ;;  %v337_v18 = vand.u32 2147483647, %v333_v13  ;;  %v338_v20 = vand.u32 2147483647, %v334_v14 }
  0x32   : > { %v339_v21 = vand.u32 2147483647, %v335_v15  ;;  %v361_v22 = vrot.slane %v360_v19, 2  ;;  %v340_v23 = vand.u32 2147483647, %v336_v16  ;;  %v330_v51 = vmul.f32 %v329_v45, %v858_v0 }
  0x33   : > { %588 = vpow2.f32 %v316_v17  ;;  %v341_v24 = vadd.f32 %v338_v20, %v337_v18  ;;  %v310_v47 = vadd.f32 0.005, %v309_v39 }
  0x34   : > { %v362_v25 = vadd.f32 %v361_v22, %v360_v19 }
  0x35   : > { %v342_v26 = vadd.f32 %v341_v24, %v339_v21 }
  0x36   : > { %v363_v27 = vrot.slane %v362_v25, 1 }
  0x37   : > { %v343_v28 = vadd.f32 %v342_v26, %v340_v23 }
  0x38   : > { %v364_v30 = vadd.f32 %v363_v27, %v362_v25 }
  0x39   : > { %v589_v29 = vpop.eup %588  ;;  %v351_v33 = vmul.f32 %v343_v28, %v299_v2 }
  0x3a   : > { %v318_v31 = vadd.f32 1.0, %v589_v29  ;;  %v321_v32 = vmul.f32 -0.5, %v589_v29  ;;  %365 = vst [vmem:[%s868_s28 + $0x2] sm:$0x1] %v364_v30  ;;  %v324_v36 = vand.u32 2147483647, %v589_v29 }
  0x3b   : > { %v352_v34 = vrot.slane %v351_v33, 4 }
  0x3c   : > { %590 = vlog2.f32 %v318_v31  ;;  %v322_v35 = vadd.f32 1.0, %v321_v32  ;;  %vm325_vm0 = vcmp.lt.f32.partialorder %v324_v36, 0.0004427343 }
  0x3d   : > { %v353_v37 = vadd.f32 %v352_v34, %v351_v33 }
  0x3e   : > { %v323_v40 = vmul.f32 %v589_v29, %v322_v35 }
  0x3f   : > { %v354_v38 = vrot.slane %v353_v37, 2 }
  0x41   : > { %v355_v43 = vadd.f32 %v354_v38, %v353_v37 }
  0x42   : > { %v591_v41 = vpop.eup %590 }
  0x43   : > { %v320_v44 = vmul.f32 0.6931472, %v591_v41  ;;  %v356_v46 = vrot.slane %v355_v43, 1 }
  0x45   : > { %v326_v48 = vsel %vm325_vm0, %v323_v40, %v320_v44  ;;  %v357_v50 = vadd.f32 %v356_v46, %v355_v43 }
  0x46   : > { %v327_v49 = vadd.f32 %v326_v48, %v311_v42 }
  0x47   : > { %358 = vst [vmem:[%s868_s28 + $0x1] sm:$0x1] %v357_v50 }
  0x48   : > { %v328_v52 = vsel %vm312_vm1, %v858_v0, %v327_v49 }
  0x49   : > { %v331_v53 = vmul.f32 %v328_v52, %v310_v47 }
  0x4b   : > { %v332_v54 = vsub.f32 %v330_v51, %v331_v53 }
  0x4d   : > { %v344_v55 = vrot.slane %v332_v54, 4 }
  0x4f   : > { %v345_v56 = vadd.f32 %v344_v55, %v332_v54 }
  0x51   : > { %v346_v57 = vrot.slane %v345_v56, 2 }
  0x53   : > { %v347_v58 = vadd.f32 %v346_v57, %v345_v56 }
  0x55   : > { %v348_v59 = vrot.slane %v347_v58, 1 }
  0x57   : > { %v349_v60 = vadd.f32 %v348_v59, %v347_v58 }
  0x59   : > { %350 = vst [vmem:[%s868_s28] sm:$0x1] %v349_v60 }
  0x5a PF: > { %s19_s17 = sadd.s32 1, %s736_s17   ;;  %s910_s15 = sld [smem:[#allocation10_spill]] }
  0x5b   : > { %p16_p0 = scmp.ge.s32.totalorder %s19_s17, 4   ;;  %s911_s29 = sld [smem:[#allocation9_spill]] }
  0x5c   : > { %s912_s12 = smov %s720_s13  ;;  %s913_s13 = smov %s724_s14 }
  0x5d   :  { %18 = sbr.rel (!%p16_p0) target bundleno = 8 (0x8), region = 97 }
  0x60   : > { %s914_s14 = smov %s910_s15  ;;  %s915_s15 = smov %s732_s16 }
  0x61   : > { %s916_s16 = smov %s911_s29 }
  0x62   :  { %391 = vsyncpa [#allocation3], 1 }
  0x63   :  { %393 = vsyncpa [#allocation3 + $0x1], 1 }
  0x64   :  { %394 = vsyncpa [#allocation5], 1 }
  0x65   :  { %396 = vsyncpa [#allocation5 + $0x1], 1 }

</bundles_post_ra>
